<compile_context>
chip_gen: v7x
topology: tpu7x:2x2x1
jax: 0.10.0
libtpu: 0.0.40
codegen_flags: <defaults>
</compile_context>

<pallas_src>
import jax
import jax.numpy as jnp
from jax import lax
from jax.experimental import pallas as pl
from jax.experimental.pallas import tpu as pltpu


def actor_kernel(x_ref, w1_ref, b1_ref, w2_ref, b2_ref, w3_ref, b3_ref, o_ref):
    """One batch tile.  x_ref: (tile, S) native layout; o_ref: (tile, A).

    Intermediates are feature-major (features, tile) so the batch rides the
    128-wide lane axis; the input transpose is folded into the first dot and
    the output transpose is done in-kernel (XLU) right before the store.
    """
    x = x_ref[...]
    # layer1: W1 @ x^T + b1, ReLU                      -> (H1, tile)
    h1 = lax.dot_general(w1_ref[...], x, (((1,), (1,)), ((), ())),
                         preferred_element_type=jnp.float32)
    h1 = jnp.maximum(h1 + b1_ref[...], 0.0)
    # layer2: W2 @ h1 + b2, ReLU                       -> (H2, tile)
    h2 = jnp.dot(w2_ref[...], h1, preferred_element_type=jnp.float32)
    h2 = jnp.maximum(h2 + b2_ref[...], 0.0)
    # layer3: W3 @ h2 + b3, Tanh (lane-dense on EUP)   -> (A, tile)
    h3 = jnp.dot(w3_ref[...], h2, preferred_element_type=jnp.float32)
    y = jnp.tanh(h3 + b3_ref[...])
    # Store as (tile, A): transpose folded into the kernel, no extra XLA pass.
    o_ref[...] = y.T.astype(o_ref.dtype)


def _cdiv(a, b):
    return (a + b - 1) // b


def _round_up(n, m):
    return _cdiv(n, m) * m


def _choose_tiling(batch, tile_b, min_steps):
    # >= min_steps grid steps (so both v7x TCs get work), tile a multiple of
    # 128 rows, and padding limited to < 128 * n_steps rows.
    n_steps = max(min_steps, _cdiv(batch, tile_b))
    tile = _round_up(_cdiv(batch, n_steps), 128)
    b_pad = tile * n_steps
    return tile, n_steps, b_pad


def actor_forward(x, params, *, tile_b=4096, min_steps=2, io_dtype=None):
    """x: (B, state_dim). params: PyTorch layout ((out, in) weights, (out,) biases).

    Returns (B, action_dim) in x's dtype (or io_dtype if given).
    io_dtype=jnp.bfloat16 halves the dominant x/out HBM traffic (v5e); dots and
    activations still run in f32 inside the kernel.
    """
    w1, b1 = params["w1"], params["b1"]
    w2, b2 = params["w2"], params["b2"]
    w3, b3 = params["w3"], params["b3"]

    B, state_dim = x.shape
    n_hidden_1 = w1.shape[0]
    n_hidden_2 = w2.shape[0]
    action_dim = w3.shape[0]

    tile, n_steps, b_pad = _choose_tiling(B, tile_b, min_steps)

    if io_dtype is not None:
        x = x.astype(io_dtype)
        w1 = w1.astype(io_dtype)
        w2 = w2.astype(io_dtype)
        w3 = w3.astype(io_dtype)
    out_dtype = x.dtype

    # Biases as (out, 1) columns (broadcast across batch lanes); kept in f32.
    b1c = b1.reshape(n_hidden_1, 1).astype(jnp.float32)
    b2c = b2.reshape(n_hidden_2, 1).astype(jnp.float32)
    b3c = b3.reshape(action_dim, 1).astype(jnp.float32)

    # x stays in native (B, S) layout; only zero-pad the batch axis when the
    # tile does not divide it (no wrapper-side transpose of x).
    if b_pad != B:
        x = jnp.pad(x, ((0, b_pad - B), (0, 0)))

    def resident(arr):
        # Constant block index -> block stays resident in VMEM across steps.
        return pl.BlockSpec(arr.shape, lambda i: (0, 0))

    in_specs = [
        pl.BlockSpec((tile, state_dim), lambda i: (i, 0)),   # x batch tile
        resident(w1), resident(b1c),
        resident(w2), resident(b2c),
        resident(w3), resident(b3c),
    ]
    out_specs = pl.BlockSpec((tile, action_dim), lambda i: (i, 0))

    param_bytes = sum(int(p.size) * p.dtype.itemsize
                      for p in (w1, b1c, w2, b2c, w3, b3c))
    flops = 2 * b_pad * (state_dim * n_hidden_1
                         + n_hidden_1 * n_hidden_2
                         + n_hidden_2 * action_dim)
    bytes_accessed = (int(x.size) * x.dtype.itemsize + param_bytes
                      + b_pad * action_dim * jnp.dtype(out_dtype).itemsize)
    cost = pl.CostEstimate(flops=int(flops),
                           transcendentals=int(b_pad * action_dim),
                           bytes_accessed=int(bytes_accessed))

    out = pl.pallas_call(
        actor_kernel,
        out_shape=jax.ShapeDtypeStruct((b_pad, action_dim), out_dtype),
        grid=(n_steps,),
        in_specs=in_specs,
        out_specs=out_specs,
        compiler_params=pltpu.CompilerParams(
            dimension_semantics=("parallel",),   # v7x: batch tiles across 2 TCs
        ),
        cost_estimate=cost,
    )(x, w1, b1c, w2, b2c, w3, b3c)

    return out if b_pad == B else out[:B]


def init_params(key, state_dim, action_dim, n_hidden_1, n_hidden_2):
    """PyTorch-style uniform(-1/sqrt(fan_in), 1/sqrt(fan_in)) init.

    Weights (out, in), biases (out,) — same layout as nn.Linear."""
    def linear(key, fan_in, fan_out):
        kw, kb = jax.random.split(key)
        bound = 1.0 / jnp.sqrt(fan_in)
        w = jax.random.uniform(kw, (fan_out, fan_in), jnp.float32, -bound, bound)
        b = jax.random.uniform(kb, (fan_out,), jnp.float32, -bound, bound)
        return w, b

    k1, k2, k3 = jax.random.split(key, 3)
    w1, b1 = linear(k1, state_dim, n_hidden_1)
    w2, b2 = linear(k2, n_hidden_1, n_hidden_2)
    w3, b3 = linear(k3, n_hidden_2, action_dim)
    return {"w1": w1, "b1": b1, "w2": w2, "b2": b2, "w3": w3, "b3": b3}


def actor_ref(x, params):
    """Pure-JAX reference (matches the PyTorch forward)."""
    h1 = jnp.maximum(x @ params["w1"].T + params["b1"], 0.0)
    h2 = jnp.maximum(h1 @ params["w2"].T + params["b2"], 0.0)
    return jnp.tanh(h2 @ params["w3"].T + params["b3"])


if __name__ == "__main__":
    key = jax.random.PRNGKey(0)
    k_param, k_x1, k_x2, k_x3 = jax.random.split(key, 4)

    state_dim = 16
    action_dim = 8
    n_hidden_1 = 32
    n_hidden_2 = 32

    params = init_params(k_param, state_dim, action_dim, n_hidden_1, n_hidden_2)

    # 1) Small batch, f32 I/O (2-step grid of 128-row tiles, batch padded).
    x = jax.random.normal(k_x1, (8, state_dim), dtype=jnp.float32)
    out = actor_forward(x, params)
    jax.block_until_ready(out)
    ref = actor_ref(x, params)
    assert out.shape == (8, action_dim)
    assert jnp.allclose(out, ref, atol=1e-5, rtol=1e-5)

    # 2) Ragged batch: 3-step grid, padding path, resident-weight reuse.
    x2 = jax.random.normal(k_x2, (260, state_dim), dtype=jnp.float32)
    out2 = actor_forward(x2, params, tile_b=128)
    jax.block_until_ready(out2)
    ref2 = actor_ref(x2, params)
    assert out2.shape == (260, action_dim)
    assert jnp.allclose(out2, ref2, atol=1e-5, rtol=1e-5)

    # 3) bf16-I/O path (v5e HBM-bandwidth variant); f32 compute inside, looser tol.
    x3 = jax.random.normal(k_x3, (1024, state_dim), dtype=jnp.float32)
    out3 = actor_forward(x3, params, io_dtype=jnp.bfloat16)
    jax.block_until_ready(out3)
    ref3 = actor_ref(x3, params)
    assert out3.shape == (1024, action_dim) and out3.dtype == jnp.bfloat16
    assert jnp.allclose(out3.astype(jnp.float32), ref3, atol=5e-2)

    print("KERNEL_OK")
</pallas_src>

<mosaic_0001>
module attributes {stable_mosaic.version = 11 : i64} {
  func.func @actor_kernel(%arg0: i32, %arg1: memref<128x16xf32, #tpu.memory_space<vmem>>, %arg2: memref<32x16xf32, #tpu.memory_space<vmem>>, %arg3: memref<32x1xf32, #tpu.memory_space<vmem>>, %arg4: memref<32x32xf32, #tpu.memory_space<vmem>>, %arg5: memref<32x1xf32, #tpu.memory_space<vmem>>, %arg6: memref<8x32xf32, #tpu.memory_space<vmem>>, %arg7: memref<8x1xf32, #tpu.memory_space<vmem>>, %arg8: memref<128x8xf32, #tpu.memory_space<vmem>>) attributes {dimension_semantics = [#tpu.dimension_semantics<parallel>], iteration_bounds = array<i64: 2>, scalar_prefetch = 0 : i64, scratch_operands = 0 : i64, tpu.core_type = #tpu.core_type<tc>, window_params = [{transform_indices = @transform_0, window_bounds = array<i64: 128, 16>}, {pipeline_mode = #tpu.pipeline_mode<synchronous>, transform_indices = @transform_1, window_bounds = array<i64: 32, 16>}, {pipeline_mode = #tpu.pipeline_mode<synchronous>, transform_indices = @transform_2, window_bounds = array<i64: 32, 1>}, {pipeline_mode = #tpu.pipeline_mode<synchronous>, transform_indices = @transform_3, window_bounds = array<i64: 32, 32>}, {pipeline_mode = #tpu.pipeline_mode<synchronous>, transform_indices = @transform_4, window_bounds = array<i64: 32, 1>}, {pipeline_mode = #tpu.pipeline_mode<synchronous>, transform_indices = @transform_5, window_bounds = array<i64: 8, 32>}, {pipeline_mode = #tpu.pipeline_mode<synchronous>, transform_indices = @transform_6, window_bounds = array<i64: 8, 1>}, {transform_indices = @transform_7, window_bounds = array<i64: 128, 8>}]} {
    %c0 = arith.constant 0 : index
    %c0_0 = arith.constant 0 : index
    %0 = vector.load %arg1[%c0, %c0_0] : memref<128x16xf32, #tpu.memory_space<vmem>>, vector<128x16xf32>
    %c0_1 = arith.constant 0 : index
    %c0_2 = arith.constant 0 : index
    %1 = vector.load %arg2[%c0_1, %c0_2] : memref<32x16xf32, #tpu.memory_space<vmem>>, vector<32x16xf32>
    %cst = arith.constant dense<0.000000e+00> : vector<32x128xf32>
    %2 = tpu.matmul %1, %0, %cst {dimension_numbers = #tpu.dot_dimension_numbers<[1], [1], [0], [0], [0, 0, 1, 0], [], []>} : vector<32x16xf32>, vector<128x16xf32>, vector<32x128xf32> -> vector<32x128xf32>
    %c0_3 = arith.constant 0 : index
    %c0_4 = arith.constant 0 : index
    %3 = vector.load %arg3[%c0_3, %c0_4] : memref<32x1xf32, #tpu.memory_space<vmem>>, vector<32x1xf32>
    %4 = vector.broadcast %3 : vector<32x1xf32> to vector<32x128xf32>
    %5 = arith.addf %2, %4 : vector<32x128xf32>
    %cst_5 = arith.constant 0.000000e+00 : f32
    %6 = vector.broadcast %cst_5 : f32 to vector<32x128xf32>
    %7 = arith.maximumf %5, %6 : vector<32x128xf32>
    %c0_6 = arith.constant 0 : index
    %c0_7 = arith.constant 0 : index
    %8 = vector.load %arg4[%c0_6, %c0_7] : memref<32x32xf32, #tpu.memory_space<vmem>>, vector<32x32xf32>
    %cst_8 = arith.constant dense<0.000000e+00> : vector<32x128xf32>
    %9 = tpu.matmul %8, %7, %cst_8 {dimension_numbers = #tpu.dot_dimension_numbers<[1], [0], [0], [1], [0, 0, 1, 1], [], []>} : vector<32x32xf32>, vector<32x128xf32>, vector<32x128xf32> -> vector<32x128xf32>
    %c0_9 = arith.constant 0 : index
    %c0_10 = arith.constant 0 : index
    %10 = vector.load %arg5[%c0_9, %c0_10] : memref<32x1xf32, #tpu.memory_space<vmem>>, vector<32x1xf32>
    %11 = vector.broadcast %10 : vector<32x1xf32> to vector<32x128xf32>
    %12 = arith.addf %9, %11 : vector<32x128xf32>
    %cst_11 = arith.constant 0.000000e+00 : f32
    %13 = vector.broadcast %cst_11 : f32 to vector<32x128xf32>
    %14 = arith.maximumf %12, %13 : vector<32x128xf32>
    %c0_12 = arith.constant 0 : index
    %c0_13 = arith.constant 0 : index
    %15 = vector.load %arg6[%c0_12, %c0_13] : memref<8x32xf32, #tpu.memory_space<vmem>>, vector<8x32xf32>
    %cst_14 = arith.constant dense<0.000000e+00> : vector<8x128xf32>
    %16 = tpu.matmul %15, %14, %cst_14 {dimension_numbers = #tpu.dot_dimension_numbers<[1], [0], [0], [1], [0, 0, 1, 1], [], []>} : vector<8x32xf32>, vector<32x128xf32>, vector<8x128xf32> -> vector<8x128xf32>
    %c0_15 = arith.constant 0 : index
    %c0_16 = arith.constant 0 : index
    %17 = vector.load %arg7[%c0_15, %c0_16] : memref<8x1xf32, #tpu.memory_space<vmem>>, vector<8x1xf32>
    %18 = vector.broadcast %17 : vector<8x1xf32> to vector<8x128xf32>
    %19 = arith.addf %16, %18 : vector<8x128xf32>
    %20 = math.tanh %19 : vector<8x128xf32>
    %21 = tpu.transpose %20, [1, 0] : vector<8x128xf32> -> vector<128x8xf32>
    %c0_17 = arith.constant 0 : index
    %c0_18 = arith.constant 0 : index
    %22 = vector.load %arg8[%c0_17, %c0_18] : memref<128x8xf32, #tpu.memory_space<vmem>>, vector<128x8xf32>
    tpu.vector_store %arg8[%c0_17, %c0_18], %21 {strides = array<i32>} : memref<128x8xf32, #tpu.memory_space<vmem>>, vector<128x8xf32>,
    return
  }
  func.func @transform_0(%arg0: i32) -> (i32, i32) {
    %c0_i32 = arith.constant 0 : i32
    %c0_i32_0 = arith.constant 0 : i32
    return %arg0, %c0_i32 : i32, i32
  }
  func.func @transform_1(%arg0: i32) -> (i32, i32) {
    %c0_i32 = arith.constant 0 : i32
    %c0_i32_0 = arith.constant 0 : i32
    %c0_i32_1 = arith.constant 0 : i32
    return %c0_i32, %c0_i32_0 : i32, i32
  }
  func.func @transform_2(%arg0: i32) -> (i32, i32) {
    %c0_i32 = arith.constant 0 : i32
    %c0_i32_0 = arith.constant 0 : i32
    %c0_i32_1 = arith.constant 0 : i32
    return %c0_i32, %c0_i32_0 : i32, i32
  }
  func.func @transform_3(%arg0: i32) -> (i32, i32) {
    %c0_i32 = arith.constant 0 : i32
    %c0_i32_0 = arith.constant 0 : i32
    %c0_i32_1 = arith.constant 0 : i32
    return %c0_i32, %c0_i32_0 : i32, i32
  }
  func.func @transform_4(%arg0: i32) -> (i32, i32) {
    %c0_i32 = arith.constant 0 : i32
    %c0_i32_0 = arith.constant 0 : i32
    %c0_i32_1 = arith.constant 0 : i32
    return %c0_i32, %c0_i32_0 : i32, i32
  }
  func.func @transform_5(%arg0: i32) -> (i32, i32) {
    %c0_i32 = arith.constant 0 : i32
    %c0_i32_0 = arith.constant 0 : i32
    %c0_i32_1 = arith.constant 0 : i32
    return %c0_i32, %c0_i32_0 : i32, i32
  }
  func.func @transform_6(%arg0: i32) -> (i32, i32) {
    %c0_i32 = arith.constant 0 : i32
    %c0_i32_0 = arith.constant 0 : i32
    %c0_i32_1 = arith.constant 0 : i32
    return %c0_i32, %c0_i32_0 : i32, i32
  }
  func.func @transform_7(%arg0: i32) -> (i32, i32) {
    %c0_i32 = arith.constant 0 : i32
    %c0_i32_0 = arith.constant 0 : i32
    return %arg0, %c0_i32 : i32, i32
  }
}

</mosaic_0001>

<bundles_post_ra>
// kernel: tpu_custom_call.1
= control target key start
LH: loop header
LB: loop body
LE: loop exit
PB: predicated region body
PF: predicated region fallthrough
CT: control target
= control target key end

     0   :  { %s1054_s24 = smov 0   ;;  %s1231_s0 = inlined_call_operand.vmem [shape: f32[256,16], index: 0, kind: input, shape index: {}]   ;;  %s1232_s1 = inlined_call_operand.vmem [shape: f32[32,16], index: 1, kind: input, shape index: {}]   ;;  %s1233_s2 = inlined_call_operand.vmem [shape: f32[32,1], index: 2, kind: input, shape index: {}]   ;;  %s1234_s3 = inlined_call_operand.vmem [shape: f32[32,32], index: 3, kind: input, shape index: {}]   ;;  %s1235_s4 = inlined_call_operand.vmem [shape: f32[32,1], index: 4, kind: input, shape index: {}]   ;;  %s1236_s5 = inlined_call_operand.vmem [shape: f32[8,32], index: 5, kind: input, shape index: {}]   ;;  %s1237_s6 = inlined_call_operand.vmem [shape: f32[8,1], index: 6, kind: input, shape index: {}]   ;;  %s1238_s7 = inlined_call_operand.vmem [shape: f32[256,8], index: 7, kind: output, shape index: {}]  }
   0x1 LB: > { %s792_s25 = sadd.s32 4294967295, %s1008_s24   ;;  %p796_p0 = scmp.ge.s32.totalorder %s1008_s24, 1  ;;  %s1008_s24 = sphi %s1054_s24, %s17_s24  }
   0x2   : > { %p238_p1 = scmp.lt.s32.totalorder %s1008_s24, 3 }
   0x4   : > { %p239_p2 = pnand %p796_p0, %p238_p1 }
   0x5   : > { %s797_s26 = sshll.u32 (!%p239_p2), %s792_s25, 4  ;;  %vm326_vm0 = vcmask (!%p239_p2), 130048   ;;  %v298_v0 = vld [vmem:[%s1232_s1] sm:$0xff] (!%p239_p2)  ;;  %v1010_v1 = vmov (!%p239_p2), 0   ;;  %v304_v3 = vld [vmem:[%s1233_s2 + $0x10] sm:$0xff] (!%p239_p2)  ;;  %v303_v4 = vld [vmem:[%s1233_s2 + $0x8] sm:$0xff] (!%p239_p2) }
   0x6   : > { %242 = sbr.rel (%p239_p2) target bundleno = 951 (0x3b7), region = 48  ;;  %p271_p3 = scmp.lt.s32.totalorder (!%p239_p2), %s797_s26, 31  ;;  %893 = vmatprep.mubr.msk.f32.mxu0 (!%p239_p2), %vm326_vm0, %v298_v0  ;;  %998 = vset.pattern.permute.xlu0 (!%p239_p2), %v1010_v1  ;;  %v302_v2 = vld [vmem:[%s1233_s2] sm:$0xff] (!%p239_p2)  ;;  %v305_v5 = vld [vmem:[%s1233_s2 + $0x18] sm:$0xff] (!%p239_p2)  ;;  %vm1090_vm1 = vmpackc.low (!%p239_p2), %vm326_vm0, %vm326_vm0  ;;  %vm504_vm2 = vcmask (!%p239_p2), 261120   ;;  %v1011_v61 = vmov (!%p239_p2), 0.0|0.0  }
   0x7   : > { %308 = vperm.xlu0 (!%p239_p2), %998, %v302_v2   ;;  %999 = vset.pattern.permute.xlu1 (!%p239_p2), %v1010_v1  ;;  %v480_v7 = vld [vmem:[%s1235_s4] sm:$0xff] (!%p239_p2)  ;;  %v481_v13 = vld [vmem:[%s1235_s4 + $0x8] sm:$0xff] (!%p239_p2)  ;;  %v482_v15 = vld [vmem:[%s1235_s4 + $0x10] sm:$0xff] (!%p239_p2)  ;;  %vm1012_vm3 = vmmov (!%p239_p2), 0   ;;  %v1013_v62 = vmov (!%p239_p2), 0.0   ;;  %vm719_vm4 = vcmask (!%p239_p2), 64512  }
   0x8   : > { %318 = vperm.xlu1 (!%p239_p2), %999, %v304_v3   ;;  %v483_v16 = vld [vmem:[%s1235_s4 + $0x18] sm:$0xff] (!%p239_p2)  ;;  %v607_v19 = vld [vmem:[%s1237_s6] sm:$0xff] (!%p239_p2)  ;;  %v299_v36 = vld [vmem:[%s1232_s1 + $0x8] sm:$0xff] (!%p239_p2) }
   0x9   : > { %v300_v37 = vld [vmem:[%s1232_s1 + $0x10] sm:$0xff] (!%p239_p2)  ;;  %v301_v38 = vld [vmem:[%s1232_s1 + $0x18] sm:$0xff] (!%p239_p2)  ;;  %v476_v39 = vld [vmem:[%s1234_s3] sm:$0xff] (!%p239_p2) }
   0xa   : > { %907 = vmatprep.mubr.msk.f32.mxu1 (!%p239_p2), %vm504_vm2, %v476_v39  ;;  %v477_v58 = vld [vmem:[%s1234_s3 + $0x8] sm:$0xff] (!%p239_p2)  ;;  %v478_v59 = vld [vmem:[%s1234_s3 + $0x10] sm:$0xff] (!%p239_p2)  ;;  %v479_v60 = vld [vmem:[%s1234_s3 + $0x18] sm:$0xff] (!%p239_p2) }
   0xb   : > { %313 = vperm.xlu0 (!%p239_p2), %998, %v303_v4  }
   0xc   : > { %323 = vperm.xlu1 (!%p239_p2), %999, %v305_v5  }
   0xd   : > { %s1242_s26 = smov (!%p271_p3, %s797_s26), 31 }
   0xe   : > { %s798_s14 = sshll.u32 %s1242_s26, 3 }
   0xf   : > { %s1086_s17 = scalar_lea.vmem %s1231_s0, %s798_s14  ;;  %486 = vperm.xlu0 %998, %v480_v7   ;;  %s1194_s28 = scalar_lea.vmem %s1238_s7, %s798_s14 }
  0x10   : > { %v282_v8 = vld [vmem:[%s1086_s17] sm:$0xff]  ;;  %v283_v9 = vld [vmem:[%s1086_s17 + $0x8] sm:$0xff]  ;;  %v284_v10 = vld [vmem:[%s1086_s17 + $0x10] sm:$0xff]  ;;  %491 = vperm.xlu1 %999, %v481_v13  }
  0x11   : > { %v924_v11 = vpack.c.bf16 %v283_v9, %v282_v8  ;;  %v285_v12 = vld [vmem:[%s1086_s17 + $0x18] sm:$0xff]  ;;  %v286_v17 = vld [vmem:[%s1086_s17 + $0x20] sm:$0xff]  ;;  %v287_v18 = vld [vmem:[%s1086_s17 + $0x28] sm:$0xff] }
  0x12   : > { %v930_v14 = vpack.c.bf16 %v285_v12, %v284_v10  ;;  %v936_v20 = vpack.c.bf16 %v287_v18, %v286_v17  ;;  %v288_v21 = vld [vmem:[%s1086_s17 + $0x30] sm:$0xff]  ;;  %v289_v22 = vld [vmem:[%s1086_s17 + $0x38] sm:$0xff]  ;;  %v290_v24 = vld [vmem:[%s1086_s17 + $0x40] sm:$0xff] }
  0x13   : > { %926 = vmatprep.subr.msk.bf16.mxu0 %vm1090_vm1, %v924_v11  ;;  %496 = vperm.xlu0 %998, %v482_v15   ;;  %v942_v23 = vpack.c.bf16 %v289_v22, %v288_v21  ;;  %v291_v25 = vld [vmem:[%s1086_s17 + $0x48] sm:$0xff]  ;;  %v292_v27 = vld [vmem:[%s1086_s17 + $0x50] sm:$0xff]  ;;  %v293_v28 = vld [vmem:[%s1086_s17 + $0x58] sm:$0xff] }
  0x14   : > { %929 = vmatpush3.bf16.xpose.msk.msra.mxu0 %vm1090_vm1, %v924_v11  ;;  %501 = vperm.xlu1 %999, %v483_v16   ;;  %v948_v26 = vpack.c.bf16 %v291_v25, %v290_v24  ;;  %v954_v29 = vpack.c.bf16 %v293_v28, %v292_v27  ;;  %v294_v30 = vld [vmem:[%s1086_s17 + $0x60] sm:$0xff]  ;;  %v295_v31 = vld [vmem:[%s1086_s17 + $0x68] sm:$0xff]  ;;  %v296_v33 = vld [vmem:[%s1086_s17 + $0x70] sm:$0xff] }
  0x15   : > { %932 = vmatprep.subr.msk.bf16.mxu0 %vm1090_vm1, %v930_v14  ;;  %v960_v32 = vpack.c.bf16 %v295_v31, %v294_v30  ;;  %v297_v34 = vld [vmem:[%s1086_s17 + $0x78] sm:$0xff]  ;;  %v606_v17 = vld [vmem:[%s1236_s5] sm:$0xff] }
  0x16   : > { %v966_v35 = vpack.c.bf16 %v297_v34, %v296_v33 }
  0x17   : > { %610 = vperm.xlu0 %998, %v607_v19  }
  0x1c   : > { %935 = vmatpush3.bf16.xpose.msk.msra.mxu0 %vm1090_vm1, %v930_v14 }
  0x1d   : > { %938 = vmatprep.subr.msk.bf16.mxu0 %vm1090_vm1, %v936_v20 }
  0x24   : > { %941 = vmatpush3.bf16.xpose.msk.msra.mxu0 %vm1090_vm1, %v936_v20 }
  0x25   : > { %944 = vmatprep.subr.msk.bf16.mxu0 %vm1090_vm1, %v942_v23 }
  0x2c   : > { %947 = vmatpush3.bf16.xpose.msk.msra.mxu0 %vm1090_vm1, %v942_v23 }
  0x2d   : > { %950 = vmatprep.subr.msk.bf16.mxu0 %vm1090_vm1, %v948_v26 }
  0x34   : > { %953 = vmatpush3.bf16.xpose.msk.msra.mxu0 %vm1090_vm1, %v948_v26 }
  0x35   : > { %956 = vmatprep.subr.msk.bf16.mxu0 %vm1090_vm1, %v954_v29 }
  0x3c   : > { %959 = vmatpush3.bf16.xpose.msk.msra.mxu0 %vm1090_vm1, %v954_v29 }
  0x3d   : > { %962 = vmatprep.subr.msk.bf16.mxu0 %vm1090_vm1, %v960_v32 }
  0x44   : > { %965 = vmatpush3.bf16.xpose.msk.msra.mxu0 %vm1090_vm1, %v960_v32 }
  0x45   : > { %968 = vmatprep.subr.msk.bf16.mxu0 %vm1090_vm1, %v966_v35 }
  0x4c   : > { %971 = vmatpush3.bf16.xpose.msk.msra.mxu0 %vm1090_vm1, %v966_v35 }
  0x53   : > { %894 = vmatmul.mubr.msk.f32.vlgmr.msra.gmra.mrb[0].mxu0 %vm326_vm0, %v299_v36 }
  0x54   : > { %896 = vmatprep.mubr.msk.f32.mxu0 %vm326_vm0, %v300_v37 }
  0x57   : > { %897 = vmatmul.mubr.msk.f32.gmra.mrb[2].mxu0 %vm326_vm0, %v301_v38 }
  0x86   : > { %v309_v40 = vpop.permute.xlu0 %308 }
  0x87   : > { %v319_v41 = vpop.permute.xlu1 %318 }
  0x8a   : > { %v314_v42 = vpop.permute.xlu0 %313 }
  0x8b   : > { %v324_v48 = vpop.permute.xlu1 %323 }
  0x8e   : > { %v487_v0 = vpop.permute.xlu0 %486 }
  0x8f   : > { %v492_v63 = vpop.permute.xlu1 %491 }
  0x92   : > { %v497_v9 = vpop.permute.xlu0 %496 }
  0x93   : > { %v502_v6 = vpop.permute.xlu1 %501 }
  0x96   : > { %v611_v18 = vpop.permute.xlu0 %610 }
 0x126   : > { %v895_v43 = vpop.f32.mrb[0].mxu0 }
 0x127   : > { %v459_v44 = vadd.f32 %v895_v43, %v314_v42  ;;  %v453_v45 = vpop.f32.mrb[1].mxu0 }
 0x128   : > { %v454_v46 = vadd.f32 %v453_v45, %v309_v40 }
 0x129   : > { %v473_v47 = vmax.f32 %v459_v44, 0.0 }
 0x12a   : > { %v472_v49 = vmax.f32 %v454_v46, 0.0  ;;  %v898_v50 = vpop.f32.mrb[2].mxu0 }
 0x12b   : > { %v469_v51 = vadd.f32 %v898_v50, %v324_v48  ;;  %v463_v52 = vpop.f32.mrb[3].mxu0 }
 0x12c   : > { %v464_v53 = vadd.f32 %v463_v52, %v319_v41  ;;  %v972_v54 = vpack.c.bf16 %v473_v47, %v472_v49 }
 0x12d   : > { %v475_v55 = vmax.f32 %v469_v51, 0.0 }
 0x12e   : > { %v474_v56 = vmax.f32 %v464_v53, 0.0  ;;  %973 = vmatprep.subr.bf16.mxu1 %v972_v54 }
 0x12f   : > { %975 = vmatpush3.bf16.msra.mxu1 %v972_v54 }
 0x130   : > { %v976_v57 = vpack.c.bf16 %v475_v55, %v474_v56 }
 0x132   : > { %977 = vmatprep.subr.bf16.mxu1 %v976_v57 }
 0x133   : > { %979 = vmatpush3.bf16.msra.mxu1 %v976_v57 }
 0x134   : > { %980 = vmatprep.subr.bf16.mxu1 %v1011_v61 }
 0x136   : > { %908 = vmatmul.mubr.msk.f32.vlgmr.msra.gmra.mrb[0].mxu1 %vm504_vm2, %v477_v58 }
 0x137   : > { %910 = vmatprep.mubr.msk.f32.mxu1 %vm504_vm2, %v478_v59 }
 0x13a   : > { %911 = vmatmul.mubr.msk.f32.gmra.mrb[2].mxu1 %vm504_vm2, %v479_v60 }
 0x13b   : > { %921 = vmatprep.mubr.msk.f32.mxu1 %vm1012_vm3, %v1013_v62 }
 0x209   : > { %v909_v1 = vpop.f32.mrb[0].mxu1 }
 0x20a   : > { %v589_v2 = vadd.f32 %v909_v1, %v492_v63  ;;  %v583_v3 = vpop.f32.mrb[1].mxu1 }
 0x20b   : > { %v584_v4 = vadd.f32 %v583_v3, %v487_v0 }
 0x20c   : > { %v603_v5 = vmax.f32 %v589_v2, 0.0 }
 0x20d   : > { %v602_v7 = vmax.f32 %v584_v4, 0.0  ;;  %v912_v8 = vpop.f32.mrb[2].mxu1 }
 0x20e   : > { %v599_v10 = vadd.f32 %v912_v8, %v502_v6  ;;  %v593_v11 = vpop.f32.mrb[3].mxu1 }
 0x20f   : > { %v981_v12 = vpack.c.bf16 %v603_v5, %v602_v7  ;;  %v594_v13 = vadd.f32 %v593_v11, %v497_v9 }
 0x210   : > { %v605_v14 = vmax.f32 %v599_v10, 0.0 }
 0x211   : > { %v604_v15 = vmax.f32 %v594_v13, 0.0  ;;  %982 = vmatpush3.bf16.msra.mxu1 %v981_v12 }
 0x212   : > { %983 = vmatprep.subr.bf16.mxu1 %v1011_v61 }
 0x213   : > { %v984_v16 = vpack.c.bf16 %v605_v14, %v604_v15 }
 0x215   : > { %985 = vmatpush3.bf16.msra.mxu1 %v984_v16 }
 0x218   : > { %922 = vmatmul.mubr.msk.f32.vlgmr.msra.gmra.mrb[4].mxu1 %vm504_vm2, %v606_v17 }
 0x2eb   : > { %v682_v19 = vpop.f32.mrb[4].mxu1 }
 0x2ec   : > { %v683_v20 = vadd.f32 %v682_v19, %v611_v18  ;;  %v923_v21 = vpop.f32.mrb[5].mxu1 }
 0x2ee   : > { %1000 = vtanh.f32 %v683_v20 }
 0x2f8   : > { %v1001_v22 = vpop.eup %1000 }
 0x2f9   : > { %687 = vxpose.xlu1.b32.start.end [1/1] (short) %v1001_v22, 128 }
 0x379   : > { %v703_v23 = vpop.trf.xlu1 }
 0x37a   : > { %720 = vst.msk [vmem:[%s1194_s28] sm:$0xff] %vm719_vm4, %v703_v23 }
 0x37d   : > { %v704_v24 = vpop.trf.xlu1 }
 0x37e   : > { %721 = vst.msk [vmem:[%s1194_s28 + $0x8] sm:$0xff] %vm719_vm4, %v704_v24 }
 0x381   : > { %v705_v25 = vpop.trf.xlu1 }
 0x382   : > { %722 = vst.msk [vmem:[%s1194_s28 + $0x10] sm:$0xff] %vm719_vm4, %v705_v25 }
 0x385   : > { %v706_v26 = vpop.trf.xlu1 }
 0x386   : > { %723 = vst.msk [vmem:[%s1194_s28 + $0x18] sm:$0xff] %vm719_vm4, %v706_v26 }
 0x389   : > { %v707_v27 = vpop.trf.xlu1 }
 0x38a   : > { %724 = vst.msk [vmem:[%s1194_s28 + $0x20] sm:$0xff] %vm719_vm4, %v707_v27 }
 0x38d   : > { %v708_v28 = vpop.trf.xlu1 }
 0x38e   : > { %725 = vst.msk [vmem:[%s1194_s28 + $0x28] sm:$0xff] %vm719_vm4, %v708_v28 }
 0x391   : > { %v709_v29 = vpop.trf.xlu1 }
 0x392   : > { %726 = vst.msk [vmem:[%s1194_s28 + $0x30] sm:$0xff] %vm719_vm4, %v709_v29 }
 0x395   : > { %v710_v30 = vpop.trf.xlu1 }
 0x396   : > { %727 = vst.msk [vmem:[%s1194_s28 + $0x38] sm:$0xff] %vm719_vm4, %v710_v30 }
 0x399   : > { %v711_v31 = vpop.trf.xlu1 }
 0x39a   : > { %728 = vst.msk [vmem:[%s1194_s28 + $0x40] sm:$0xff] %vm719_vm4, %v711_v31 }
 0x39d   : > { %v712_v32 = vpop.trf.xlu1 }
 0x39e   : > { %729 = vst.msk [vmem:[%s1194_s28 + $0x48] sm:$0xff] %vm719_vm4, %v712_v32 }
 0x3a1   : > { %v713_v33 = vpop.trf.xlu1 }
 0x3a2   : > { %730 = vst.msk [vmem:[%s1194_s28 + $0x50] sm:$0xff] %vm719_vm4, %v713_v33 }
 0x3a5   : > { %v714_v34 = vpop.trf.xlu1 }
 0x3a6   : > { %731 = vst.msk [vmem:[%s1194_s28 + $0x58] sm:$0xff] %vm719_vm4, %v714_v34 }
 0x3a9   : > { %v715_v35 = vpop.trf.xlu1 }
 0x3aa   : > { %732 = vst.msk [vmem:[%s1194_s28 + $0x60] sm:$0xff] %vm719_vm4, %v715_v35 }
 0x3ad   : > { %v716_v36 = vpop.trf.xlu1 }
 0x3ae   : > { %733 = vst.msk [vmem:[%s1194_s28 + $0x68] sm:$0xff] %vm719_vm4, %v716_v36 }
 0x3b1   : > { %v717_v37 = vpop.trf.xlu1 }
 0x3b2   : > { %734 = vst.msk [vmem:[%s1194_s28 + $0x70] sm:$0xff] %vm719_vm4, %v717_v37 }
 0x3b5   : > { %v718_v38 = vpop.trf.xlu1 }
 0x3b6   : > { %735 = vst.msk [vmem:[%s1194_s28 + $0x78] sm:$0xff] %vm719_vm4, %v718_v38 }
 0x3b7 PF: > { %s17_s24 = sadd.s32 1, %s1008_s24  }
 0x3b8   : > { %p14_p4 = scmp.ge.s32.totalorder %s17_s24, 4  }
 0x3ba   :  { %16 = sbr.rel (!%p14_p4) target bundleno = 1 (0x1), region = 78 }

</bundles_post_ra>
